<compile_context>
chip_gen: v7x
topology: tpu7x:2x2x1
jax: 0.10.0
libtpu: 0.0.40
codegen_flags: <defaults>
</compile_context>

<pallas_src>
import functools

import jax
import jax.numpy as jnp
from jax.experimental import pallas as pl
from jax.experimental.pallas import tpu as pltpu


# --------------------------------------------------------------------------- #
# Kernels
# --------------------------------------------------------------------------- #
def _fused_kernel(x_ref, w_ref, b_ref, o_ref, *, precision):
    # x_ref: (TB, P*Cin)        batch tile of the flattened input
    # w_ref: (P*Cin, P*Cout)    block-diagonal weight (resident across grid steps)
    # b_ref: (1, P*Cout) f32    flattened bias row (resident, pre-cast in wrapper)
    # o_ref: (TB, P*Cout)       batch tile of the flattened output
    acc = jnp.dot(x_ref[...], w_ref[...],
                  preferred_element_type=jnp.float32, precision=precision)
    o_ref[...] = (acc + b_ref[...]).astype(o_ref.dtype)


def _grouped_kernel(x_ref, w_ref, b_ref, o_ref, *, precision):
    # x_ref: (TB, P, Cin); w_ref: (P, Cin, TCout); b_ref: (P, TCout) f32;
    # o_ref: (TB, P, TCout).  Per-group MXU dots fed from ref sub-views; each store is
    # a lane-dense (TB, TCout) tile (TCout is a multiple of 128 or the full Cout).
    P = w_ref.shape[0]
    for g in range(P):  # static unroll; P (num_parallel) is small
        acc = jnp.dot(x_ref[:, g, :], w_ref[g],
                      preferred_element_type=jnp.float32, precision=precision)
        o_ref[:, g, :] = (acc + b_ref[g:g + 1, :]).astype(o_ref.dtype)


# --------------------------------------------------------------------------- #
# Sizing helpers
# --------------------------------------------------------------------------- #
def _vmem_capacity_bytes():
    """Best-effort per-TensorCore VMEM capacity; conservative when unknown."""
    try:
        kind = jax.devices()[0].device_kind.lower()
    except Exception:  # pragma: no cover
        kind = ""
    if any(t in kind for t in ("v4", "v5", "v6")):
        return 128 << 20          # v4 / v5e / v5p / v6e
    return 64 << 20               # v7x (2 TCs x 64 MiB) or unknown: stay conservative


def _choose_block_b(B, row_bytes, resident_bytes, budget_bytes):
    """Pick a batch-tile height: big enough to amortize per-step overhead & DMA setup,
    small enough that the double-buffered in/out tiles + resident operands fit VMEM,
    and (for v7x megacore) giving >=2 parallel grid steps when B allows it."""
    if B <= 8:
        return B                                   # block == full dim (8-sublane rule)
    avail = max(budget_bytes - resident_bytes, 2 << 20)
    max_rows = avail // (2 * row_bytes)            # 2x: double-buffered in + out tiles
    block_b = max(8, (min(max_rows, 4096, B) // 8) * 8)
    if block_b >= B and B >= 16:
        # Single-step grid would leave v7x's second TensorCore idle: split in two.
        block_b = min(block_b, (((B + 1) // 2 + 7) // 8) * 8)
    return int(block_b)


def _vmem_limit(block_b, row_bytes, resident_bytes, cap):
    needed = 2 * block_b * row_bytes + resident_bytes + (4 << 20)
    return int(min(max(needed, 32 << 20), cap - (16 << 20)))


# --------------------------------------------------------------------------- #
# Wrappers
# --------------------------------------------------------------------------- #
def _parallel_linear_fused(x, weight, bias_row_f32, precision, cap, block_b):
    B, P, Cin = x.shape
    Cout = weight.shape[-1]
    itemsize = jnp.dtype(x.dtype).itemsize

    # Pack the block-diagonal weight (P*Cin, P*Cout) once (ideally hoisted to param
    # init / jit constant folding); zeros off the diagonal.
    w_bd = jnp.zeros((P * Cin, P * Cout), dtype=weight.dtype)
    for g in range(P):
        w_bd = w_bd.at[g * Cin:(g + 1) * Cin, g * Cout:(g + 1) * Cout].set(weight[g])

    # Free row-major reshapes only -- no transposes.
    x2 = x.reshape(B, P * Cin)

    row_bytes = (P * Cin + P * Cout) * itemsize
    resident = (2 * (P * Cin) * (P * Cout) * jnp.dtype(weight.dtype).itemsize
                + 2 * P * Cout * 4)
    if block_b is None:
        block_b = _choose_block_b(B, row_bytes, resident, cap // 2)
    grid_b = pl.cdiv(B, block_b)

    kernel = functools.partial(_fused_kernel, precision=precision)
    out2 = pl.pallas_call(
        kernel,
        out_shape=jax.ShapeDtypeStruct((B, P * Cout), x.dtype),
        grid_spec=pltpu.PrefetchScalarGridSpec(
            num_scalar_prefetch=0,
            grid=(grid_b,),
            in_specs=[
                pl.BlockSpec((block_b, P * Cin), lambda i: (i, 0)),
                pl.BlockSpec((P * Cin, P * Cout), lambda i: (0, 0)),   # resident weight
                pl.BlockSpec((1, P * Cout), lambda i: (0, 0)),         # resident bias
            ],
            out_specs=pl.BlockSpec((block_b, P * Cout), lambda i: (i, 0)),
        ),
        compiler_params=pltpu.CompilerParams(
            dimension_semantics=("parallel",),     # batch tiles independent (megacore)
            vmem_limit_bytes=_vmem_limit(block_b, row_bytes, resident, cap),
        ),
    )(x2, w_bd, bias_row_f32)
    return out2.reshape(B, P, Cout)


def _parallel_linear_grouped(x, weight, bias_f32, precision, cap, block_b):
    B, P, Cin = x.shape
    Cout = weight.shape[-1]
    itemsize = jnp.dtype(x.dtype).itemsize

    # Lane-dense Cout tiles: multiple of 128 (unmasked wide stores) or the full Cout.
    t_cout = min(Cout, 512) if Cout % 128 == 0 else Cout
    n_cout = pl.cdiv(Cout, t_cout)

    row_bytes = P * (Cin + t_cout) * itemsize
    resident = (2 * P * Cin * t_cout * jnp.dtype(weight.dtype).itemsize
                + 2 * P * t_cout * 4)
    if block_b is None:
        block_b = _choose_block_b(B, row_bytes, resident, cap // 2)

    kernel = functools.partial(_grouped_kernel, precision=precision)
    return pl.pallas_call(
        kernel,
        out_shape=jax.ShapeDtypeStruct((B, P, Cout), x.dtype),
        grid_spec=pltpu.PrefetchScalarGridSpec(
            num_scalar_prefetch=0,
            grid=(pl.cdiv(B, block_b), n_cout),
            in_specs=[
                pl.BlockSpec((block_b, P, Cin), lambda i, j: (i, 0, 0)),
                pl.BlockSpec((P, Cin, t_cout), lambda i, j: (0, 0, j)),
                pl.BlockSpec((P, t_cout), lambda i, j: (0, j)),
            ],
            out_specs=pl.BlockSpec((block_b, P, t_cout), lambda i, j: (i, 0, j)),
        ),
        compiler_params=pltpu.CompilerParams(
            dimension_semantics=("parallel", "parallel"),
            vmem_limit_bytes=_vmem_limit(block_b, row_bytes, resident, cap),
        ),
    )(x, weight, bias_f32)


def parallel_linear(x, weight, bias, *, block_b=None, precision=None):
    """x: (B, P, Cin); weight: (P, Cin, Cout); bias: (P, Cout) -> (B, P, Cout).

    Keep x/weight in bf16 where the model allows (halves HBM traffic, native MXU on
    v6e/v7x); accumulation is always f32.  f32 inputs default to Precision.HIGHEST for
    parity with PyTorch f32 GEMM.
    """
    B, P, Cin = x.shape
    Cout = weight.shape[-1]
    if precision is None:
        precision = (jax.lax.Precision.HIGHEST if x.dtype == jnp.float32
                     else jax.lax.Precision.DEFAULT)
    cap = _vmem_capacity_bytes()

    if P * Cin <= 512 and P * Cout <= 512:
        bias_row = bias.reshape(1, P * Cout).astype(jnp.float32)   # cast hoisted here
        return _parallel_linear_fused(x, weight, bias_row, precision, cap, block_b)
    bias_f32 = bias.astype(jnp.float32)
    return _parallel_linear_grouped(x, weight, bias_f32, precision, cap, block_b)


def conv1d_params_to_grouped(conv_weight, conv_bias, num_parallel):
    """Convert PyTorch Conv1d params (P*Cout, Cin, 1), (P*Cout,) to (P, Cin, Cout), (P, Cout)."""
    pc_out, c_in, _ = conv_weight.shape
    c_out = pc_out // num_parallel
    w = conv_weight.reshape(num_parallel, c_out, c_in)          # (P, Cout, Cin)
    w = jnp.swapaxes(w, 1, 2)                                   # (P, Cin, Cout)
    b = conv_bias.reshape(num_parallel, c_out)
    return w, b


if __name__ == "__main__":
    # Shapes consistent with the module: batch=2, num_parallel=4, in_channels=8, out_channels=16.
    B, P, CIN, COUT = 2, 4, 8, 16

    key = jax.random.PRNGKey(0)
    kx, kw, kb = jax.random.split(key, 3)

    x = jax.random.normal(kx, (B, P, CIN), dtype=jnp.float32)
    # Conv1d weight (P*COUT, CIN, 1) reorganized as per-group matrices (P, CIN, COUT);
    # bias (P*COUT,) -> (P, COUT).
    weight = jax.random.normal(kw, (P, CIN, COUT), dtype=jnp.float32) * 0.1
    bias = jax.random.normal(kb, (P, COUT), dtype=jnp.float32) * 0.1

    out = parallel_linear(x, weight, bias)
    out = jax.block_until_ready(out)

    # Plain-JAX reference of the grouped 1x1 conv (same precision as the kernel path).
    ref = jnp.einsum("bpi,pio->bpo", x, weight,
                     precision=jax.lax.Precision.HIGHEST) + bias[None]
    assert out.shape == (B, P, COUT)
    assert jnp.allclose(out, ref, atol=1e-5, rtol=1e-5)

    print("KERNEL_OK")
</pallas_src>

<mosaic_0001>
module attributes {stable_mosaic.version = 11 : i64} {
  func.func @_fused_kernel(%arg0: i32, %arg1: memref<2x32xf32, #tpu.memory_space<vmem>>, %arg2: memref<32x64xf32, #tpu.memory_space<vmem>>, %arg3: memref<1x64xf32, #tpu.memory_space<vmem>>, %arg4: memref<2x64xf32, #tpu.memory_space<vmem>>) attributes {dimension_semantics = [#tpu.dimension_semantics<parallel>], iteration_bounds = array<i64: 1>, scalar_prefetch = 0 : i64, scratch_operands = 0 : i64, tpu.core_type = #tpu.core_type<tc>, window_params = [{transform_indices = @transform_0, window_bounds = array<i64: 2, 32>}, {pipeline_mode = #tpu.pipeline_mode<synchronous>, transform_indices = @transform_1, window_bounds = array<i64: 32, 64>}, {pipeline_mode = #tpu.pipeline_mode<synchronous>, transform_indices = @transform_2, window_bounds = array<i64: 1, 64>}, {transform_indices = @transform_3, window_bounds = array<i64: 2, 64>}]} {
    %c0 = arith.constant 0 : index
    %c0_0 = arith.constant 0 : index
    %0 = vector.load %arg1[%c0, %c0_0] : memref<2x32xf32, #tpu.memory_space<vmem>>, vector<2x32xf32>
    %c0_1 = arith.constant 0 : index
    %c0_2 = arith.constant 0 : index
    %1 = vector.load %arg2[%c0_1, %c0_2] : memref<32x64xf32, #tpu.memory_space<vmem>>, vector<32x64xf32>
    %cst = arith.constant dense<0.000000e+00> : vector<2x64xf32>
    %2 = tpu.matmul %0, %1, %cst {dimension_numbers = #tpu.dot_dimension_numbers<[1], [0], [0], [1], [0, 0, 1, 1], [], []>, precision = #tpu.contract_precision<fp32>} : vector<2x32xf32>, vector<32x64xf32>, vector<2x64xf32> -> vector<2x64xf32>
    %c0_3 = arith.constant 0 : index
    %c0_4 = arith.constant 0 : index
    %3 = vector.load %arg3[%c0_3, %c0_4] : memref<1x64xf32, #tpu.memory_space<vmem>>, vector<1x64xf32>
    %4 = vector.broadcast %3 : vector<1x64xf32> to vector<2x64xf32>
    %5 = arith.addf %2, %4 : vector<2x64xf32>
    %c0_5 = arith.constant 0 : index
    %c0_6 = arith.constant 0 : index
    %6 = vector.load %arg4[%c0_5, %c0_6] : memref<2x64xf32, #tpu.memory_space<vmem>>, vector<2x64xf32>
    tpu.vector_store %arg4[%c0_5, %c0_6], %5 {strides = array<i32>} : memref<2x64xf32, #tpu.memory_space<vmem>>, vector<2x64xf32>,
    return
  }
  func.func @transform_0(%arg0: i32) -> (i32, i32) {
    %c0_i32 = arith.constant 0 : i32
    %c0_i32_0 = arith.constant 0 : i32
    return %arg0, %c0_i32 : i32, i32
  }
  func.func @transform_1(%arg0: i32) -> (i32, i32) {
    %c0_i32 = arith.constant 0 : i32
    %c0_i32_0 = arith.constant 0 : i32
    %c0_i32_1 = arith.constant 0 : i32
    return %c0_i32, %c0_i32_0 : i32, i32
  }
  func.func @transform_2(%arg0: i32) -> (i32, i32) {
    %c0_i32 = arith.constant 0 : i32
    %c0_i32_0 = arith.constant 0 : i32
    %c0_i32_1 = arith.constant 0 : i32
    return %c0_i32, %c0_i32_0 : i32, i32
  }
  func.func @transform_3(%arg0: i32) -> (i32, i32) {
    %c0_i32 = arith.constant 0 : i32
    %c0_i32_0 = arith.constant 0 : i32
    return %arg0, %c0_i32 : i32, i32
  }
}

</mosaic_0001>

<bundles_post_ra>
// kernel: tpu_custom_call.1
= control target key start
LH: loop header
LB: loop body
LE: loop exit
PB: predicated region body
PF: predicated region fallthrough
CT: control target
= control target key end

     0   :  { %8 = vsyncpa [#allocation3], 0  ;;  %s881_s0 = inlined_call_operand.hbm [shape: f32[2,32], index: 0, kind: input, shape index: {}]   ;;  %s882_s1 = inlined_call_operand.hbm [shape: f32[32,64], index: 1, kind: input, shape index: {}]   ;;  %s883_s2 = inlined_call_operand.vmem [shape: f32[1,64], index: 2, kind: input, shape index: {}]   ;;  %s884_s3 = inlined_call_operand.hbm [shape: f32[2,64], index: 3, kind: output, shape index: {}]  }
   0x1   :  { %9 = vsyncpa [#allocation6], 0 }
   0x2   :  { %10 = vsyncpa [#allocation4], 0  ;;  %s783_s12 = smov [#allocation2]   ;;  %s784_s14 = smov [#allocation5]  }
   0x3   :  { %s17_s13 = sshll.u32 %s783_s12, 4  ;;  %s26_s15 = sshll.u32 %s784_s14, 4  ;;  %s18_s13 = int_to_ptr.vmem [resolvable:$true] %s17_s13  ;;  %s811_s15 = int_to_ptr.vmem [resolvable:$true] %s26_s15 }
   0x4   :  { %s711_s18 = scalar_lea.hbm %s881_s0, 32 }
   0x5   :  { %p712_p0 = scmp.ne.s32.totalorder %s881_s0, %s711_s18  ;;  %p715_p1 = scmp.lt.u32.totalorder %s711_s18, %s881_s0 }
   0x7   :  { %p717_p2 = pnand %p715_p1, %p712_p0 }
   0x9   :  { %720 = shalt.err (!%p717_p2)
}
   0xa   :  { %s721_s23 = scalar_lea.vmem %s18_s13, 32  ;;  %p726_p4 = scmp.lt.s32.totalorder %s18_s13, %s18_s13 }
   0xb   :  { %p722_p3 = scmp.ne.s32.totalorder %s18_s13, %s721_s23  ;;  %p727_p5 = scmp.lt.s32.totalorder %s721_s23, %s721_s23 }
   0xd   :  { %p728_p6 = por %p727_p5, %p726_p4 }
   0xf   :  { %p729_p7 = pnand %p728_p6, %p722_p3 }
  0x11   :  { %732 = shalt.err (!%p729_p7)
}
  0x12   :  { %20 = dma.hbm_to_vmem [thread:$0]  %s881_s0, 32, %s18_s13, [#allocation3]  }
  0x13   :  { %s733_s28 = scalar_lea.hbm %s882_s1, 512 }
  0x14   :  { %p734_p8 = scmp.ne.s32.totalorder %s882_s1, %s733_s28  ;;  %p737_p9 = scmp.lt.u32.totalorder %s733_s28, %s882_s1 }
  0x16   :  { %p739_p10 = pnand %p737_p9, %p734_p8 }
  0x18   :  { %742 = shalt.err (!%p739_p10)
}
  0x19   :  { %s743_s6 = scalar_lea.vmem %s811_s15, 512  ;;  %p748_p12 = scmp.lt.s32.totalorder %s811_s15, %s811_s15 }
  0x1a   :  { %p744_p11 = scmp.ne.s32.totalorder %s811_s15, %s743_s6  ;;  %p749_p13 = scmp.lt.s32.totalorder %s743_s6, %s743_s6 }
  0x1c   :  { %p750_p0 = por %p749_p13, %p748_p12 }
  0x1e   :  { %p751_p1 = pnand %p750_p0, %p744_p11 }
  0x20   :  { %754 = shalt.err (!%p751_p1)
}
  0x21   :  { %s785_s0 = smov 128   ;;  %s786_s7 = smov 8  }
  0x22   :  { %32 = dma.hbm_to_vmem [thread:$0]  %s882_s1, 512, %s811_s15, [#allocation6], %s785_s0, %s785_s0, %s786_s7  }
  0x23   :  { %777 = dma.done.wait [#allocation3], 32  }
  0x24   :  { %778 = vsyncadd [#allocation3], 4294967264 }
  0x25   :  { %779 = dma.done.wait [#allocation6], 512  }
  0x26   :  { %780 = vsyncadd [#allocation6], 4294966784  ;;  %v787_v0 = vmov 0.0|0.0   ;;  %vm788_vm0 = vmmov 0   ;;  %v789_v1 = vmov 0.0   ;;  %vm53_vm1 = vcmask 261120  }
  0x27   :  { %657 = vmatprep.subr.bf16.mxu1 %v787_v0  ;;  %675 = vmatprep.subr.bf16.mxu0 %v787_v0  ;;  %v42_v2 = vld [vmem:[#allocation5] sm:$0xff]  ;;  %v43_v3 = vld [vmem:[#allocation5 + $0x8] sm:$0xff]  ;;  %v44_v4 = vld [vmem:[#allocation5 + $0x10] sm:$0xff]  ;;  %s790_s11 = smov [#allocation7]   ;;  %vm542_vm2 = vcmask 517120  }
  0x28   :  { %599 = vmatprep.mubr.msk.f32.mxu1 %vm788_vm0, %v789_v1  ;;  %632 = vmatprep.mubr.msk.f32.mxu0 %vm788_vm0, %v789_v1  ;;  %v58_v5 = vand.u32 4294901760, %v42_v2  ;;  %v61_v6 = vand.u32 4294901760, %v43_v3  ;;  %v45_v7 = vld [vmem:[#allocation5 + $0x18] sm:$0xff]  ;;  %v64_v8 = vand.u32 4294901760, %v44_v4  ;;  %s550_s12 = sshll.u32 %s790_s11, 4  ;;  %s551_s12 = int_to_ptr.vmem [resolvable:$true] %s550_s12 }
  0x29   :  { %v41_v9 = vld [vmem:[#allocation2] sm:$0x3]  ;;  %v67_v10 = vand.u32 4294901760, %v45_v7  ;;  %s755_s13 = scalar_lea.vmem %s551_s12, 32  ;;  %p760_p3 = scmp.lt.s32.totalorder %s551_s12, %s551_s12 }
  0x2a   :  { %v55_v11 = vsel %vm53_vm1, %v41_v9, 0  ;;  %v658_v12 = vpack.c.bf16 %v61_v6, %v58_v5  ;;  %v138_v13 = vsub.f32 %v42_v2, %v58_v5  ;;  %v145_v14 = vsub.f32 %v43_v3, %v61_v6  ;;  %v560_v41 = vld [vmem:[%s883_s2] ss:$0 sm:$0xff]  ;;  %p756_p2 = scmp.ne.s32.totalorder %s551_s12, %s755_s13  ;;  %p761_p4 = scmp.lt.s32.totalorder %s755_s13, %s755_s13 }
  0x2b   :  { %v152_v15 = vsub.f32 %v44_v4, %v64_v8  ;;  %v159_v16 = vsub.f32 %v45_v7, %v67_v10  ;;  %v126_v17 = vand.u32 4294901760, %v55_v11  ;;  %v661_v18 = vpack.c.bf16 %v67_v10, %v64_v8 }
  0x2c   :  { %659 = vmatpush3.bf16.msra.mxu1 %v658_v12  ;;  %677 = vmatpush3.bf16.msra.mxu0 %v658_v12  ;;  %v139_v19 = vand.u32 4294901760, %v138_v13  ;;  %v146_v20 = vand.u32 4294901760, %v145_v14  ;;  %v670_v39 = vpack.c.bf16 %v145_v14, %v138_v13  ;;  %p762_p5 = por %p761_p4, %p760_p3 }
  0x2d   :  { %v153_v21 = vand.u32 4294901760, %v152_v15  ;;  %660 = vmatprep.subr.bf16.mxu1 %v787_v0  ;;  %678 = vmatprep.subr.bf16.mxu0 %v787_v0  ;;  %v127_v22 = vsub.f32 %v55_v11, %v126_v17  ;;  %v160_v23 = vand.u32 4294901760, %v159_v16  ;;  %v673_v40 = vpack.c.bf16 %v159_v16, %v152_v15 }
  0x2e   :  { %v140_v24 = vsub.f32 %v138_v13, %v139_v19  ;;  %v147_v25 = vsub.f32 %v145_v14, %v146_v20  ;;  %v682_v31 = vpack.c.bf16 %v146_v20, %v139_v19  ;;  %p763_p6 = pnand %p762_p5, %p756_p2 }
  0x2f   :  { %v154_v26 = vsub.f32 %v152_v15, %v153_v21  ;;  %v128_v27 = vand.u32 4294901760, %v127_v22  ;;  %v161_v28 = vsub.f32 %v159_v16, %v160_v23  ;;  %v685_v37 = vpack.c.bf16 %v160_v23, %v153_v21 }
  0x30   :  { %662 = vmatpush3.bf16.msra.mxu1 %v661_v18  ;;  %680 = vmatpush3.bf16.msra.mxu0 %v661_v18  ;;  %v141_v29 = vand.u32 4294901760, %v140_v24  ;;  %v148_v30 = vand.u32 4294901760, %v147_v25 }
  0x31   :  { %v129_v32 = vsub.f32 %v127_v22, %v128_v27  ;;  %663 = vmatprep.subr.bf16.mxu1 %v787_v0  ;;  %681 = vmatprep.subr.bf16.mxu0 %v787_v0  ;;  %v155_v34 = vand.u32 4294901760, %v154_v26  ;;  %v162_v35 = vand.u32 4294901760, %v161_v28 }
  0x32   :  { %v664_v33 = vpack.c.bf16 %v148_v30, %v141_v29 }
  0x33   :  { %v130_v36 = vand.u32 4294901760, %v129_v32  ;;  %633 = vmatmul.mubr.f32.vlgmr.msra.gmra.mrb[0].mxu0 %v128_v27  ;;  %v667_v38 = vpack.c.bf16 %v162_v35, %v155_v34 }
  0x34   :  { %683 = vmatpush3.bf16.msra.mxu0 %v682_v31  ;;  %643 = vmatprep.mubr.msk.f32.mxu0 %vm788_vm0, %v789_v1 }
  0x35   :  { %600 = vmatmul.mubr.f32.vlgmr.msra.gmra.mrb[0].mxu1 %v130_v36  ;;  %684 = vmatprep.subr.bf16.mxu0 %v787_v0 }
  0x36   :  { %665 = vmatpush3.bf16.msra.mxu1 %v664_v33  ;;  %610 = vmatprep.mubr.msk.f32.mxu1 %vm788_vm0, %v789_v1 }
  0x37   :  { %666 = vmatprep.subr.bf16.mxu1 %v787_v0 }
  0x38   :  { %686 = vmatpush3.bf16.msra.mxu0 %v685_v37 }
  0x39   :  { %687 = vmatprep.subr.bf16.mxu0 %v787_v0 }
  0x3a   :  { %668 = vmatpush3.bf16.msra.mxu1 %v667_v38 }
  0x3b   :  { %669 = vmatprep.subr.bf16.mxu1 %v787_v0  ;;  %644 = vmatmul.mubr.f32.vlgmr.msra.gmra.mrb[0].mxu0 %v126_v17 }
  0x3c   :  { %689 = vmatpush3.bf16.msra.mxu0 %v658_v12  ;;  %654 = vmatprep.mubr.msk.f32.mxu0 %vm788_vm0, %v789_v1 }
  0x3d   :  { %611 = vmatmul.mubr.f32.vlgmr.msra.gmra.mrb[0].mxu1 %v126_v17  ;;  %690 = vmatprep.subr.bf16.mxu0 %v787_v0 }
  0x3e   :  { %671 = vmatpush3.bf16.msra.mxu1 %v670_v39  ;;  %621 = vmatprep.mubr.msk.f32.mxu1 %vm788_vm0, %v789_v1 }
  0x3f   :  { %672 = vmatprep.subr.bf16.mxu1 %v787_v0 }
  0x40   :  { %692 = vmatpush3.bf16.msra.mxu0 %v661_v18 }
  0x42   :  { %674 = vmatpush3.bf16.msra.mxu1 %v673_v40 }
  0x43   :  { %655 = vmatmul.mubr.f32.vlgmr.msra.gmra.mrb[0].mxu0 %v126_v17 }
  0x45   :  { %622 = vmatmul.mubr.f32.vlgmr.msra.gmra.mrb[0].mxu1 %v127_v22 }
 0x116   :  { %v538_v42 = vpop.f32.mrb[0].mxu0 }
 0x117   :  { %v656_v43 = vpop.f32.mrb[1].mxu0 }
 0x118   :  { %v303_v44 = vpop.f32.mrb[0].mxu1 }
 0x119   :  { %v693_v45 = vadd.f32 %v560_v41, %v303_v44  ;;  %v623_v46 = vpop.f32.mrb[1].mxu1 }
 0x11b   :  { %v694_v47 = vadd.f32 %v693_v45, %v538_v42 }
 0x11d   :  { %543 = vst.msk [vmem:[#allocation7] sm:$0x3] %vm542_vm2, %v694_v47 }
 0x11e   :  { %766 = shalt.err (!%p763_p6)
}
 0x11f   :  { %s767_s15 = scalar_lea.hbm %s884_s3, 32 }
 0x120   :  { %p768_p7 = scmp.ne.s32.totalorder %s884_s3, %s767_s15  ;;  %p771_p8 = scmp.lt.u32.totalorder %s767_s15, %s884_s3 }
 0x122   :  { %p773_p9 = pnand %p771_p8, %p768_p7 }
 0x124   :  { %776 = shalt.err (!%p773_p9)
}
 0x125   :  { %553 = dma.vmem_to_hbm [thread:$0]  %s551_s12, 32, %s884_s3, [#allocation4]  }
 0x126   :  { %781 = dma.done.wait [#allocation4], 32  }
 0x127   :  { %782 = vsyncadd [#allocation4], 4294967264 }
 0x128   :  { %557 = vsyncpa [#allocation3], 1 }
 0x129   :  { %558 = vsyncpa [#allocation6], 1 }
 0x12a   :  { %559 = vsyncpa [#allocation4], 1 }

</bundles_post_ra>
